<compile_context>
chip_gen: v7x
topology: tpu7x:2x2x1
jax: 0.10.0
libtpu: 0.0.40
codegen_flags: <defaults>
</compile_context>

<pallas_src>
import functools

import jax
import jax.numpy as jnp
from jax.experimental import pallas as pl
from jax.experimental.pallas import tpu as pltpu


def _segmenter_kernel(x_ref, w1t_ref, b1_ref, w2t_ref, b2_ref, o_ref, *,
                      bn, strip, n_strips):
    # x_ref:   (bn, C,    TP)   channels-major pixel tile (lane axis = pixels)
    # w1t_ref: (HID,  C)        encoder 1x1-conv weight, transposed
    # b1_ref:  (HID,  1)
    # w2t_ref: (NCLS, HID)      decoder 1x1-conv weight, transposed
    # b2_ref:  (NCLS, 1)
    # o_ref:   (bn, NCLS, TP)
    w1t = w1t_ref[...]
    b1 = b1_ref[...]
    w2t = w2t_ref[...]
    b2 = b2_ref[...]

    strip_aligned = (strip % 128 == 0)

    def do_strip(b, s):
        off = s * strip
        if strip_aligned:
            off = pl.multiple_of(off, 128)
        x = x_ref[b, :, pl.ds(off, strip)]                        # (C, strip)
        h = jnp.dot(w1t, x, preferred_element_type=jnp.float32)   # (HID, strip)
        h = jnp.maximum(h + b1, 0.0)                              # encoder ReLU
        y = jnp.dot(w2t, h, preferred_element_type=jnp.float32)   # (NCLS, strip)
        o_ref[b, :, pl.ds(off, strip)] = (y + b2).astype(o_ref.dtype)

    total = bn * n_strips
    if total == 1:
        do_strip(0, 0)
    else:
        # Strip-mine pixels (and loop packed batch entries) so the hidden
        # activation stays within a few dozen vregs instead of spilling a
        # full (HID, tile_pix) temp to VMEM.
        @pl.loop(0, total)
        def _(it):
            do_strip(it // n_strips, it % n_strips)


def _largest_divisor_le(n, k):
    for d in range(min(n, k), 0, -1):
        if n % d == 0:
            return d
    return 1


def _pick_pixel_tile(hw, max_tile, min_tile):
    """Largest multiple of 128 that divides hw, within [min_tile, max_tile]."""
    for t in range(max_tile, min_tile - 1, -128):
        if hw % t == 0:
            return t
    return None


@functools.partial(jax.jit, static_argnames=("max_tile_pix",))
def segmenter_forward(x_nchw, w1, b1, w2, b2, *, max_tile_pix=65536):
    """x_nchw: [N, C, H, W] float32.  Returns [N, n_classes, H, W] float32."""
    assert max_tile_pix % 128 == 0, "max_tile_pix must be a multiple of 128"

    N, C, H, W = x_nchw.shape
    HID = w1.shape[1]
    NCLS = w2.shape[1]
    HW = H * W

    # NCHW -> [N, C, H*W] is a pure reshape (no data movement): channels-major
    # [C, M] layout consumed directly by the transposed matmul.
    x3 = x_nchw.reshape(N, C, HW)

    # ---- Pixel tiling: avoid the HBM pad/slice round trip. ------------------
    hw_pad = HW
    if HW <= max_tile_pix:
        tile_pix = HW                 # full-dim block: no 128 constraint, no pad
    else:
        tile_pix = _pick_pixel_tile(HW, max_tile_pix, min_tile=4096)
        if tile_pix is None:
            # TODO(synk): rare ragged fallback (HW > max_tile_pix with no large
            # 128-aligned divisor) still pays a pad + slice HBM round trip on
            # the tail; an in-kernel masked tail store would remove it.
            tile_pix = max_tile_pix
            hw_pad = pl.cdiv(HW, tile_pix) * tile_pix
            x3 = jnp.pad(x3, ((0, 0), (0, 0), (0, hw_pad - HW)))
    n_pix_tiles = hw_pad // tile_pix

    # ---- Batch packing: each grid step should move a meaningful chunk. ------
    bn = _largest_divisor_le(N, max(1, max_tile_pix // tile_pix))
    if bn > 1 and (N // bn) * n_pix_tiles < 2:
        # Keep >= 2 grid steps when possible so both TensorCores on v7x work.
        bn = _largest_divisor_le(N, max(1, bn // 2))
    grid = (N // bn, n_pix_tiles)

    # ---- Strip size for in-kernel strip-mining of the hidden activation. ----
    strip = tile_pix
    for s in (1024, 512, 256, 128):
        if tile_pix % s == 0:
            strip = s
            break
    n_strips = tile_pix // strip

    # Weights are tiny (KiB) — transpose once in the wrapper.
    w1t = w1.T                     # (HID, C)
    w2t = w2.T                     # (NCLS, HID)
    b1c = b1.reshape(HID, 1)
    b2c = b2.reshape(NCLS, 1)

    # VMEM working set: double-buffered x/out blocks (sublane dims pad to 8)
    # plus a few strip-sized temporaries.  Explicit limit keeps v5e (16 MiB
    # scoped default) happy and stays far below v7x's 64 MiB physical VMEM.
    x_blk = bn * max(C, 8) * tile_pix * 4
    o_blk = bn * max(NCLS, 8) * tile_pix * 4
    needed = 2 * (x_blk + o_blk) + 4 * (HID * strip * 4) + (1 << 20)
    vmem_limit = int(min(max(needed, 32 << 20), 60 << 20))

    flops = 2 * N * HW * (C * HID + HID * NCLS)
    bytes_accessed = 4 * (x3.size + N * NCLS * hw_pad
                          + w1t.size + w2t.size + b1c.size + b2c.size)
    cost = pl.CostEstimate(flops=flops, transcendentals=0,
                           bytes_accessed=bytes_accessed)

    kernel = functools.partial(_segmenter_kernel, bn=bn, strip=strip,
                               n_strips=n_strips)

    out3 = pl.pallas_call(
        kernel,
        out_shape=jax.ShapeDtypeStruct((N, NCLS, hw_pad), jnp.float32),
        grid_spec=pltpu.PrefetchScalarGridSpec(
            num_scalar_prefetch=0,
            grid=grid,
            in_specs=[
                # bn images per step; pixels on the lane axis.
                pl.BlockSpec((bn, C, tile_pix), lambda n, p: (n, 0, p)),
                pl.BlockSpec((HID, C), lambda n, p: (0, 0)),     # encoder W^T
                pl.BlockSpec((HID, 1), lambda n, p: (0, 0)),     # encoder b
                pl.BlockSpec((NCLS, HID), lambda n, p: (0, 0)),  # decoder W^T
                pl.BlockSpec((NCLS, 1), lambda n, p: (0, 0)),    # decoder b
            ],
            out_specs=pl.BlockSpec((bn, NCLS, tile_pix),
                                   lambda n, p: (n, 0, p)),
        ),
        compiler_params=pltpu.CompilerParams(
            # Both grid axes are independent -> shard across TCs on v7x.
            dimension_semantics=("parallel", "parallel"),
            vmem_limit_bytes=vmem_limit),
        cost_estimate=cost,
    )(x3, w1t, b1c, w2t, b2c)

    if hw_pad != HW:
        out3 = out3[:, :, :HW]
    # [N, NCLS, H*W] -> NCHW with a pure reshape (no transpose).
    return out3.reshape(N, NCLS, H, W)


def _reference_forward(x_nchw, w1, b1, w2, b2):
    """Pure-JAX reference (same math, no Pallas)."""
    N, C, H, W = x_nchw.shape
    x_flat = jnp.transpose(x_nchw, (0, 2, 3, 1)).reshape(-1, C)
    h = jnp.maximum(x_flat @ w1 + b1, 0.0)
    y = h @ w2 + b2
    return jnp.transpose(y.reshape(N, H, W, -1), (0, 3, 1, 2))


if __name__ == "__main__":
    key = jax.random.PRNGKey(0)
    k_x, k_w1, k_b1, k_w2, k_b2, k_x2 = jax.random.split(key, 6)

    # Primary (module-consistent) small shape: batch=2, C_in=4, H=W=16.
    N, C, H, W = 2, 4, 16, 16
    HID, NCLS = 32, 8

    x = jax.random.normal(k_x, (N, C, H, W), dtype=jnp.float32)
    w1 = jax.random.normal(k_w1, (C, HID), dtype=jnp.float32) * 0.1
    b1 = jax.random.normal(k_b1, (HID,), dtype=jnp.float32) * 0.1
    w2 = jax.random.normal(k_w2, (HID, NCLS), dtype=jnp.float32) * 0.1
    b2 = jax.random.normal(k_b2, (NCLS,), dtype=jnp.float32) * 0.1

    out = jax.block_until_ready(segmenter_forward(x, w1, b1, w2, b2))
    ref = jax.block_until_ready(_reference_forward(x, w1, b1, w2, b2))
    assert out.shape == (N, NCLS, H, W)
    assert jnp.allclose(out, ref, atol=1e-5, rtol=1e-5)

    # Secondary shape exercising batch packing + the in-kernel strip loop.
    N2, H2, W2 = 4, 64, 64
    x2 = jax.random.normal(k_x2, (N2, C, H2, W2), dtype=jnp.float32)
    out2 = jax.block_until_ready(segmenter_forward(x2, w1, b1, w2, b2))
    ref2 = jax.block_until_ready(_reference_forward(x2, w1, b1, w2, b2))
    assert out2.shape == (N2, NCLS, H2, W2)
    assert jnp.allclose(out2, ref2, atol=1e-5, rtol=1e-5)

    print("KERNEL_OK")
</pallas_src>

<mosaic_0001>
module attributes {stable_mosaic.version = 11 : i64} {
  func.func @_segmenter_kernel(%arg0: i32, %arg1: i32, %arg2: memref<1x4x256xf32, #tpu.memory_space<vmem>>, %arg3: memref<32x4xf32, #tpu.memory_space<vmem>>, %arg4: memref<32x1xf32, #tpu.memory_space<vmem>>, %arg5: memref<8x32xf32, #tpu.memory_space<vmem>>, %arg6: memref<8x1xf32, #tpu.memory_space<vmem>>, %arg7: memref<1x8x256xf32, #tpu.memory_space<vmem>>) attributes {dimension_semantics = [#tpu.dimension_semantics<parallel>, #tpu.dimension_semantics<parallel>], iteration_bounds = array<i64: 2, 1>, scalar_prefetch = 0 : i64, scratch_operands = 0 : i64, tpu.core_type = #tpu.core_type<tc>, window_params = [{transform_indices = @transform_0, window_bounds = array<i64: 1, 4, 256>}, {pipeline_mode = #tpu.pipeline_mode<synchronous>, transform_indices = @transform_1, window_bounds = array<i64: 32, 4>}, {pipeline_mode = #tpu.pipeline_mode<synchronous>, transform_indices = @transform_2, window_bounds = array<i64: 32, 1>}, {pipeline_mode = #tpu.pipeline_mode<synchronous>, transform_indices = @transform_3, window_bounds = array<i64: 8, 32>}, {pipeline_mode = #tpu.pipeline_mode<synchronous>, transform_indices = @transform_4, window_bounds = array<i64: 8, 1>}, {transform_indices = @transform_5, window_bounds = array<i64: 1, 8, 256>}]} {
    %c0 = arith.constant 0 : index
    %c0_0 = arith.constant 0 : index
    %0 = vector.load %arg3[%c0, %c0_0] : memref<32x4xf32, #tpu.memory_space<vmem>>, vector<32x4xf32>
    %c0_1 = arith.constant 0 : index
    %c0_2 = arith.constant 0 : index
    %1 = vector.load %arg4[%c0_1, %c0_2] : memref<32x1xf32, #tpu.memory_space<vmem>>, vector<32x1xf32>
    %c0_3 = arith.constant 0 : index
    %c0_4 = arith.constant 0 : index
    %2 = vector.load %arg5[%c0_3, %c0_4] : memref<8x32xf32, #tpu.memory_space<vmem>>, vector<8x32xf32>
    %c0_5 = arith.constant 0 : index
    %c0_6 = arith.constant 0 : index
    %3 = vector.load %arg6[%c0_5, %c0_6] : memref<8x1xf32, #tpu.memory_space<vmem>>, vector<8x1xf32>
    %c0_i32 = arith.constant 0 : i32
    %4 = tpu.assume_multiple %c0_i32, 128 : i32
    %c0_7 = arith.constant 0 : index
    %c0_8 = arith.constant 0 : index
    %5 = arith.index_cast %4 : i32 to index
    %6 = vector.load %arg2[%c0_7, %c0_8, %5] : memref<1x4x256xf32, #tpu.memory_space<vmem>>, vector<1x4x256xf32>
    %7 = vector.shape_cast %6 : vector<1x4x256xf32> to vector<4x256xf32>
    %cst = arith.constant dense<0.000000e+00> : vector<32x256xf32>
    %8 = tpu.matmul %0, %7, %cst {dimension_numbers = #tpu.dot_dimension_numbers<[1], [0], [0], [1], [0, 0, 1, 1], [], []>} : vector<32x4xf32>, vector<4x256xf32>, vector<32x256xf32> -> vector<32x256xf32>
    %9 = vector.broadcast %1 : vector<32x1xf32> to vector<32x256xf32>
    %10 = arith.addf %8, %9 : vector<32x256xf32>
    %cst_9 = arith.constant 0.000000e+00 : f32
    %11 = vector.broadcast %cst_9 : f32 to vector<32x256xf32>
    %12 = arith.maximumf %10, %11 : vector<32x256xf32>
    %cst_10 = arith.constant dense<0.000000e+00> : vector<8x256xf32>
    %13 = tpu.matmul %2, %12, %cst_10 {dimension_numbers = #tpu.dot_dimension_numbers<[1], [0], [0], [1], [0, 0, 1, 1], [], []>} : vector<8x32xf32>, vector<32x256xf32>, vector<8x256xf32> -> vector<8x256xf32>
    %14 = vector.broadcast %3 : vector<8x1xf32> to vector<8x256xf32>
    %15 = arith.addf %13, %14 : vector<8x256xf32>
    %c0_11 = arith.constant 0 : index
    %c0_12 = arith.constant 0 : index
    %16 = arith.index_cast %4 : i32 to index
    %17 = vector.load %arg7[%c0_11, %c0_12, %16] : memref<1x8x256xf32, #tpu.memory_space<vmem>>, vector<1x8x256xf32>
    %18 = vector.shape_cast %17 : vector<1x8x256xf32> to vector<8x256xf32>
    %19 = vector.shape_cast %15 : vector<8x256xf32> to vector<1x8x256xf32>
    tpu.vector_store %arg7[%c0_11, %c0_12, %16], %19 {strides = array<i32>} : memref<1x8x256xf32, #tpu.memory_space<vmem>>, vector<1x8x256xf32>,
    return
  }
  func.func @transform_0(%arg0: i32, %arg1: i32) -> (i32, i32, i32) {
    %c0_i32 = arith.constant 0 : i32
    %c0_i32_0 = arith.constant 0 : i32
    return %arg0, %c0_i32, %arg1 : i32, i32, i32
  }
  func.func @transform_1(%arg0: i32, %arg1: i32) -> (i32, i32) {
    %c0_i32 = arith.constant 0 : i32
    %c0_i32_0 = arith.constant 0 : i32
    %c0_i32_1 = arith.constant 0 : i32
    return %c0_i32, %c0_i32_0 : i32, i32
  }
  func.func @transform_2(%arg0: i32, %arg1: i32) -> (i32, i32) {
    %c0_i32 = arith.constant 0 : i32
    %c0_i32_0 = arith.constant 0 : i32
    %c0_i32_1 = arith.constant 0 : i32
    return %c0_i32, %c0_i32_0 : i32, i32
  }
  func.func @transform_3(%arg0: i32, %arg1: i32) -> (i32, i32) {
    %c0_i32 = arith.constant 0 : i32
    %c0_i32_0 = arith.constant 0 : i32
    %c0_i32_1 = arith.constant 0 : i32
    return %c0_i32, %c0_i32_0 : i32, i32
  }
  func.func @transform_4(%arg0: i32, %arg1: i32) -> (i32, i32) {
    %c0_i32 = arith.constant 0 : i32
    %c0_i32_0 = arith.constant 0 : i32
    %c0_i32_1 = arith.constant 0 : i32
    return %c0_i32, %c0_i32_0 : i32, i32
  }
  func.func @transform_5(%arg0: i32, %arg1: i32) -> (i32, i32, i32) {
    %c0_i32 = arith.constant 0 : i32
    %c0_i32_0 = arith.constant 0 : i32
    return %arg0, %c0_i32, %arg1 : i32, i32, i32
  }
}

</mosaic_0001>

<bundles_post_ra>
// kernel: segmenter_forward.1
= control target key start
LH: loop header
LB: loop body
LE: loop exit
PB: predicated region body
PF: predicated region fallthrough
CT: control target
= control target key end

     0   :  { %s694_s18 = smov 0   ;;  %s696_s19 = smov 0   ;;  %s761_s0 = inlined_call_operand.vmem [shape: f32[2,4,256], index: 0, kind: input, shape index: {}]   ;;  %s762_s1 = inlined_call_operand.vmem [shape: f32[32,4], index: 1, kind: input, shape index: {}]   ;;  %s763_s2 = inlined_call_operand.vmem [shape: f32[32,1], index: 2, kind: input, shape index: {}]   ;;  %s764_s3 = inlined_call_operand.vmem [shape: f32[8,32], index: 3, kind: input, shape index: {}]   ;;  %s765_s4 = inlined_call_operand.vmem [shape: f32[8,1], index: 4, kind: input, shape index: {}]   ;;  %s766_s5 = inlined_call_operand.vmem [shape: f32[2,8,256], index: 5, kind: output, shape index: {}]  }
   0x1   :  { %s698_s20 = smov 0  }
   0x2 LB: > { %s27_s21 = sadd.s32 1, %s656_s19  ;;  %p585_p0 = scmp.ge.s32.totalorder %s660_s20, 1  ;;  %s660_s20 = sphi %s698_s20, %s15_s20   ;;  %s656_s19 = sphi %s696_s19, %s768_s19   ;;  %s652_s18 = sphi %s694_s18, %s767_s18  }
   0x3   : > { %p29_p1 = scmp.ge.s32.totalorder %s27_s21, 2  ;;  %p208_p2 = scmp.lt.s32.totalorder %s660_s20, 3 }
   0x5   : > { %s770_s21 = smov (%p29_p1, %s27_s21), 0  ;;  %p209_p3 = pnand %p585_p0, %p208_p2 }
   0x6   : > { %p245_p4 = scmp.lt.s32.totalorder (!%p209_p3), %s652_s18, 1  ;;  %v662_v0 = vmov (!%p209_p3), 0.0   ;;  %v268_v1 = vld [vmem:[%s763_s2] sm:$0xff] (!%p209_p3)  ;;  %v663_v2 = vmov (!%p209_p3), 0   ;;  %v270_v3 = vld [vmem:[%s763_s2 + $0x10] sm:$0xff] (!%p209_p3)  ;;  %v269_v4 = vld [vmem:[%s763_s2 + $0x8] sm:$0xff] (!%p209_p3) }
   0x7   : > { %212 = sbr.rel (%p209_p3) target bundleno = 473 (0x1d9), region = 40  ;;  %379 = vmatprep.mubr.f32.mxu0 (!%p209_p3), %v662_v0  ;;  %485 = vmatprep.mubr.f32.mxu1 (!%p209_p3), %v662_v0  ;;  %v271_v5 = vld [vmem:[%s763_s2 + $0x18] sm:$0xff] (!%p209_p3)  ;;  %vm310_vm0 = vcmask (!%p209_p3), 1043456   ;;  %v264_v8 = vld [vmem:[%s762_s1] sm:$0xff] (!%p209_p3)  ;;  %vm297_vm1 = vcmask (!%p209_p3), 31744   ;;  %v265_v10 = vld [vmem:[%s762_s1 + $0x8] sm:$0xff] (!%p209_p3) }
   0x8   : > { %635 = vset.pattern.permute.xlu0 (!%p209_p3), %v663_v2  ;;  %636 = vset.pattern.permute.xlu1 (!%p209_p3), %v663_v2  ;;  %v273_v9 = vld [vmem:[%s765_s4] sm:$0xff] (!%p209_p3)  ;;  %v266_v11 = vld [vmem:[%s762_s1 + $0x10] sm:$0xff] (!%p209_p3)  ;;  %v267_v12 = vld [vmem:[%s762_s1 + $0x18] sm:$0xff] (!%p209_p3)  ;;  %vm417_vm2 = vcmask (!%p209_p3), 261120  }
   0x9   : > { %277 = vperm.xlu0 (!%p209_p3), %635, %v268_v1   ;;  %287 = vperm.xlu1 (!%p209_p3), %636, %v270_v3   ;;  %v272_v45 = vld [vmem:[%s764_s3] sm:$0xff] (!%p209_p3) }
   0xd   : > { %282 = vperm.xlu0 (!%p209_p3), %635, %v269_v4   ;;  %292 = vperm.xlu1 (!%p209_p3), %636, %v271_v5  }
   0xe   : > { %s772_s18 = smov (!%p245_p4, %s652_s18), 1 }
   0xf   : > { %s599_s26 = sshll.u32 %s772_s18, 3  ;;  %s600_s25 = sshll.u32 %s772_s18, 4 }
  0x10   : > { %s252_s8 = scalar_lea.vmem %s761_s0, %s599_s26  ;;  %s262_s28 = scalar_lea.vmem %s766_s5, %s600_s25 }
  0x11   : > { %v274_v6 = vld [vmem:[%s252_s8] sm:$0xff]  ;;  %414 = vperm.xlu0 %635, %v273_v9  }
  0x12   : > { %v296_v7 = vcombine.high %v274_v6, %v274_v6 }
  0x14   : > { %590 = vmatprep.subr.msk.mxu0 %vm310_vm0, %v296_v7 }
  0x15   : > { %591 = vmatpush1.msk.msra.mxu0 %vm310_vm0, %v274_v6 }
  0x16   : > { %592 = vmatmul.mubr.msk.f32.vlgmr.msra.gmra.mrb[0].mxu0 %vm297_vm1, %v264_v8 }
  0x17   : > { %385 = vmatprep.mubr.f32.mxu0 %v662_v0 }
  0x1a   : > { %593 = vmatmul.mubr.msk.f32.gmra.mrb[2].mxu0 %vm297_vm1, %v265_v10 }
  0x1b   : > { %391 = vmatprep.mubr.f32.mxu0 %v662_v0 }
  0x1e   : > { %594 = vmatmul.mubr.msk.f32.gmra.mrb[4].mxu0 %vm297_vm1, %v266_v11 }
  0x1f   : > { %397 = vmatprep.mubr.f32.mxu0 %v662_v0 }
  0x22   : > { %595 = vmatmul.mubr.msk.f32.gmra.mrb[6].mxu0 %vm297_vm1, %v267_v12 }
  0x88   : > { %v278_v13 = vpop.permute.xlu0 %277  ;;  %v288_v22 = vpop.permute.xlu1 %287 }
  0x8c   : > { %v283_v17 = vpop.permute.xlu0 %282  ;;  %v293_v33 = vpop.permute.xlu1 %292 }
  0x90   : > { %v415_v46 = vpop.permute.xlu0 %414 }
  0xe9   : > { %v381_v14 = vpop.f32.mrb[0].mxu0 }
  0xea   : > { %v383_v15 = vpop.f32.mrb[1].mxu0  ;;  %v382_v16 = vadd.f32 %v381_v14, %v278_v13 }
  0xeb   : > { %v384_v18 = vadd.f32 %v383_v15, %v278_v13 }
  0xec   : > { %v404_v24 = vmax.f32 %v382_v16, 0.0 }
  0xed   : > { %v387_v19 = vpop.f32.mrb[2].mxu0  ;;  %v405_v26 = vmax.f32 %v384_v18, 0.0 }
  0xee   : > { %v388_v20 = vadd.f32 %v387_v19, %v283_v17  ;;  %v389_v21 = vpop.f32.mrb[3].mxu0 }
  0xef   : > { %v390_v23 = vadd.f32 %v389_v21, %v283_v17 }
  0xf0   : > { %v406_v25 = vmax.f32 %v388_v20, 0.0 }
  0xf1   : > { %v407_v27 = vmax.f32 %v390_v23, 0.0  ;;  %v393_v28 = vpop.f32.mrb[4].mxu0 }
  0xf2   : > { %v395_v29 = vpop.f32.mrb[5].mxu0  ;;  %v603_v30 = vpack.c.bf16 %v406_v25, %v404_v24  ;;  %v394_v32 = vadd.f32 %v393_v28, %v288_v22 }
  0xf3   : > { %v601_v31 = vpack.c.bf16 %v407_v27, %v405_v26  ;;  %v396_v34 = vadd.f32 %v395_v29, %v288_v22 }
  0xf4   : > { %v408_v39 = vmax.f32 %v394_v32, 0.0 }
  0xf5   : > { %v399_v35 = vpop.f32.mrb[6].mxu0  ;;  %602 = vmatprep.subr.bf16.mxu1 %v601_v31  ;;  %v409_v41 = vmax.f32 %v396_v34, 0.0 }
  0xf6   : > { %v400_v36 = vadd.f32 %v399_v35, %v293_v33  ;;  %v401_v37 = vpop.f32.mrb[7].mxu0  ;;  %604 = vmatpush1.bf16.msra.mxu1 %v603_v30 }
  0xf7   : > { %v402_v38 = vadd.f32 %v401_v37, %v293_v33 }
  0xf8   : > { %v410_v40 = vmax.f32 %v400_v36, 0.0 }
  0xf9   : > { %v411_v42 = vmax.f32 %v402_v38, 0.0 }
  0xfa   : > { %v607_v43 = vpack.c.bf16 %v410_v40, %v408_v39 }
  0xfb   : > { %v605_v44 = vpack.c.bf16 %v411_v42, %v409_v41 }
  0xfd   : > { %606 = vmatprep.subr.bf16.mxu1 %v605_v44 }
  0xfe   : > { %608 = vmatpush1.bf16.msra.mxu1 %v607_v43 }
 0x101   : > { %596 = vmatmul.mubr.msk.f32.vlgmr.msra.gmra.mrb[0].mxu1 %vm417_vm2, %v272_v45 }
 0x1d4   : > { %v487_v47 = vpop.f32.mrb[0].mxu1 }
 0x1d5   : > { %v488_v48 = vadd.f32 %v487_v47, %v415_v46  ;;  %v489_v49 = vpop.f32.mrb[1].mxu1 }
 0x1d6   : > { %v490_v50 = vadd.f32 %v489_v49, %v415_v46 }
 0x1d7   : > { %492 = vst [vmem:[%s262_s28] sm:$0xff] %v488_v48 }
 0x1d8   : > { %493 = vst [vmem:[%s262_s28 + $0x8] sm:$0xff] %v490_v50 }
 0x1d9 PF: > { %s15_s20 = sadd.s32 1, %s660_s20   ;;  %s767_s18 = smov %s656_s19 }
 0x1da   : > { %p12_p5 = scmp.ge.s32.totalorder %s15_s20, 4   ;;  %s768_s19 = smov %s770_s21 }
 0x1dc   :  { %14 = sbr.rel (!%p12_p5) target bundleno = 2 (0x2), region = 70 }

</bundles_post_ra>
